<compile_context>
chip_gen: v7x
topology: tpu7x:2x2x1
jax: 0.10.0
libtpu: 0.0.40
codegen_flags: <defaults>
</compile_context>

<pallas_src>
import functools

import jax
import jax.numpy as jnp
from jax.experimental import pallas as pl
from jax.experimental.pallas import tpu as pltpu

_SUBLANE = 8    # f32 sublane tile
_LANE = 128     # lane tile
_DEFAULT_T_TILE = 2048          # lanes per block; small enough for v5e/v7x VMEM,
                                # large enough to hit ~85% of HBM roofline.
_MIN_PALLAS_ELEMS = 2048        # below this, plain XLA einsum is faster.


def _inv1x1_kernel(w_ref, z_ref, o_ref):
    # w_ref: (Cp, Cp), z_ref: (Cp, T_TILE) for the current (batch, t-tile) block.
    o_ref[...] = jnp.dot(
        w_ref[...], z_ref[...], preferred_element_type=jnp.float32
    ).astype(o_ref.dtype)


def _round_up(x, m):
    return ((x + m - 1) // m) * m


@functools.partial(jax.jit, static_argnames=("t_tile",))
def invertible_1x1_conv_apply(w, z, *, t_tile=_DEFAULT_T_TILE):
    """Apply the 1x1 conv (channel-mixing matmul) with a Pallas kernel.

    w: (C, C) weight (already the matrix to multiply by, i.e. W or W^-1)
    z: (B, C, T)
    returns: (B, C, T), same dtype as z
    """
    B, C, T = z.shape

    # Small-size fallback: launch + per-grid-step overhead dominates tiny tensors.
    if B * C * T < _MIN_PALLAS_ELEMS:
        return jnp.einsum("ij,bjt->bit", w.astype(z.dtype), z).astype(z.dtype)

    # Pad channels to a full sublane group and T to a lane-dense tile multiple.
    Cp = max(_SUBLANE, _round_up(C, _SUBLANE))
    Tt = min(_round_up(t_tile, _LANE), _round_up(T, _LANE))
    Tp = _round_up(T, Tt)

    w_p = jnp.zeros((Cp, Cp), z.dtype).at[:C, :C].set(w.astype(z.dtype))
    z_p = z
    if Cp != C or Tp != T:
        z_p = jnp.pad(z, ((0, 0), (0, Cp - C), (0, Tp - T)))

    out = pl.pallas_call(
        _inv1x1_kernel,
        out_shape=jax.ShapeDtypeStruct((B, Cp, Tp), z.dtype),
        grid_spec=pltpu.PrefetchScalarGridSpec(
            num_scalar_prefetch=0,
            grid=(B, Tp // Tt),
            in_specs=[
                # weight: same tiny (Cp, Cp) block for every grid step
                pl.BlockSpec((Cp, Cp), lambda b, t: (0, 0)),
                # input: one (batch, T-tile) slab per step; batch dim squeezed
                pl.BlockSpec((None, Cp, Tt), lambda b, t: (b, 0, t)),
            ],
            out_specs=pl.BlockSpec((None, Cp, Tt), lambda b, t: (b, 0, t)),
        ),
        compiler_params=pltpu.CompilerParams(
            # Both axes independent -> shard across TensorCores and pipeline
            # many T-tiles per core instead of one giant block per batch.
            dimension_semantics=("parallel", "parallel"),
        ),
    )(w_p, z_p)

    if Cp != C or Tp != T:
        out = out[:, :C, :T]
    return out


def init_invertible_1x1_weight(key, c):
    """Deterministic init matching the PyTorch module: QR of a random normal
    c x c matrix, first column flipped if det < 0 (so det(W) = +1)."""
    W = jnp.linalg.qr(jax.random.normal(key, (c, c), dtype=jnp.float32))[0]
    det = jnp.linalg.det(W)
    W = jnp.where(det < 0, W.at[:, 0].multiply(-1.0), W)
    return W


def invertible_1x1_conv_forward(W, z, reverse=False, W_inverse=None):
    """Forward pass of Invertible1x1Conv.

    W: (C, C) weight
    z: (B, C, T)
    reverse=False -> (z_out, log_det_W);  reverse=True -> z_out

    W_inverse: optional precomputed inverse (mirrors the PyTorch module's
    cached `self.W_inverse`); pass it in inference loops to avoid recomputing
    the tiny C x C inverse on every call.
    """
    batch_size, group_size, n_of_groups = z.shape
    if reverse:
        if W_inverse is None:
            # glue: tiny C x C inverse computed in plain JAX, matmul in Pallas
            W_inverse = jnp.linalg.inv(W.astype(jnp.float32))
        return invertible_1x1_conv_apply(W_inverse.astype(z.dtype), z)
    else:
        # TODO(synk): logdet (LU of a tiny CxC matrix) has no clean Pallas
        # equivalent; computed with jnp.linalg.slogdet as parameter glue.
        sign, logabsdet = jnp.linalg.slogdet(W.astype(jnp.float32))
        # Match torch.logdet: det < 0 -> nan, det == 0 -> -inf.
        logdet = jnp.where(
            sign > 0, logabsdet, jnp.where(sign == 0, -jnp.inf, jnp.nan)
        )
        log_det_W = (batch_size * n_of_groups) * logdet
        z_out = invertible_1x1_conv_apply(W.astype(z.dtype), z)
        return z_out, log_det_W


if __name__ == "__main__":
    key = jax.random.PRNGKey(0)
    k_w1, k_w2, k_z1, k_z2 = jax.random.split(key, 4)

    # ---- Case 1: standard WaveGlow shapes (group_size=8), lane-aligned T ----
    # Exercises the Pallas path with a (B, T-tiles) parallel grid.
    B, C, T = 2, 8, 512
    W = init_invertible_1x1_weight(k_w1, C)
    z = jax.random.normal(k_z1, (B, C, T), dtype=jnp.float32)

    z_out, log_det_W = invertible_1x1_conv_forward(W, z, reverse=False)
    jax.block_until_ready(z_out)
    jax.block_until_ready(log_det_W)

    z_ref = jnp.einsum("ij,bjt->bit", W, z)
    assert jnp.allclose(z_out, z_ref, atol=1e-4), "conv mismatch (case 1)"
    _, logabs_ref = jnp.linalg.slogdet(W)
    assert jnp.allclose(log_det_W, B * T * logabs_ref, atol=1e-4), "logdet mismatch"

    # reverse path should invert the forward transform (W^-1 cached by caller)
    W_inv = jnp.linalg.inv(W)
    z_back = invertible_1x1_conv_forward(W, z_out, reverse=True, W_inverse=W_inv)
    jax.block_until_ready(z_back)
    assert jnp.allclose(z_back, z, atol=1e-3), "inverse mismatch (case 1)"

    # ---- Case 2: small channels + unaligned T -> exercises C/T padding path ----
    B2, C2, T2 = 2, 4, 400
    W2 = init_invertible_1x1_weight(k_w2, C2)
    z2 = jax.random.normal(k_z2, (B2, C2, T2), dtype=jnp.float32)
    z2_out, _ = invertible_1x1_conv_forward(W2, z2, reverse=False)
    jax.block_until_ready(z2_out)
    z2_ref = jnp.einsum("ij,bjt->bit", W2, z2)
    assert jnp.allclose(z2_out, z2_ref, atol=1e-4), "conv mismatch (case 2)"

    # ---- Case 3: tiny problem uses the fused-XLA fallback path ----
    z3 = z2[:, :, :16]
    z3_out, _ = invertible_1x1_conv_forward(W2, z3, reverse=False)
    jax.block_until_ready(z3_out)
    assert jnp.allclose(z3_out, jnp.einsum("ij,bjt->bit", W2, z3), atol=1e-4), \
        "conv mismatch (fallback)"

    print("KERNEL_OK")
</pallas_src>

<mosaic_0001>
module attributes {stable_mosaic.version = 11 : i64} {
  func.func @_inv1x1_kernel(%arg0: i32, %arg1: i32, %arg2: memref<8x8xf32, #tpu.memory_space<vmem>>, %arg3: memref<1x8x512xf32, #tpu.memory_space<vmem>>, %arg4: memref<1x8x512xf32, #tpu.memory_space<vmem>>) attributes {dimension_semantics = [#tpu.dimension_semantics<parallel>, #tpu.dimension_semantics<parallel>], iteration_bounds = array<i64: 2, 1>, scalar_prefetch = 0 : i64, scratch_operands = 0 : i64, tpu.core_type = #tpu.core_type<tc>, window_params = [{pipeline_mode = #tpu.pipeline_mode<synchronous>, transform_indices = @transform_0, window_bounds = array<i64: 8, 8>}, {transform_indices = @transform_1, window_bounds = array<i64: 1, 8, 512>}, {transform_indices = @transform_2, window_bounds = array<i64: 1, 8, 512>}]} {
    %c0 = arith.constant 0 : index
    %c0_0 = arith.constant 0 : index
    %0 = vector.load %arg2[%c0, %c0_0] : memref<8x8xf32, #tpu.memory_space<vmem>>, vector<8x8xf32>
    %c0_1 = arith.constant 0 : index
    %c0_2 = arith.constant 0 : index
    %c0_3 = arith.constant 0 : index
    %1 = vector.load %arg3[%c0_1, %c0_2, %c0_3] : memref<1x8x512xf32, #tpu.memory_space<vmem>>, vector<1x8x512xf32>
    %2 = vector.shape_cast %1 : vector<1x8x512xf32> to vector<8x512xf32>
    %cst = arith.constant dense<0.000000e+00> : vector<8x512xf32>
    %3 = tpu.matmul %0, %2, %cst {dimension_numbers = #tpu.dot_dimension_numbers<[1], [0], [0], [1], [0, 0, 1, 1], [], []>} : vector<8x8xf32>, vector<8x512xf32>, vector<8x512xf32> -> vector<8x512xf32>
    %c0_4 = arith.constant 0 : index
    %c0_5 = arith.constant 0 : index
    %c0_6 = arith.constant 0 : index
    %4 = vector.load %arg4[%c0_4, %c0_5, %c0_6] : memref<1x8x512xf32, #tpu.memory_space<vmem>>, vector<1x8x512xf32>
    %5 = vector.shape_cast %4 : vector<1x8x512xf32> to vector<8x512xf32>
    %6 = vector.shape_cast %3 : vector<8x512xf32> to vector<1x8x512xf32>
    tpu.vector_store %arg4[%c0_4, %c0_5, %c0_6], %6 {strides = array<i32>} : memref<1x8x512xf32, #tpu.memory_space<vmem>>, vector<1x8x512xf32>,
    return
  }
  func.func @transform_0(%arg0: i32, %arg1: i32) -> (i32, i32) {
    %c0_i32 = arith.constant 0 : i32
    %c0_i32_0 = arith.constant 0 : i32
    %c0_i32_1 = arith.constant 0 : i32
    return %c0_i32, %c0_i32_0 : i32, i32
  }
  func.func @transform_1(%arg0: i32, %arg1: i32) -> (i32, i32, i32) {
    %c0_i32 = arith.constant 0 : i32
    %c0_i32_0 = arith.constant 0 : i32
    return %arg0, %c0_i32, %arg1 : i32, i32, i32
  }
  func.func @transform_2(%arg0: i32, %arg1: i32) -> (i32, i32, i32) {
    %c0_i32 = arith.constant 0 : i32
    %c0_i32_0 = arith.constant 0 : i32
    return %arg0, %c0_i32, %arg1 : i32, i32, i32
  }
}

</mosaic_0001>

<bundles_post_ra>
// kernel: invertible_1x1_conv_apply.1
= control target key start
LH: loop header
LB: loop body
LE: loop exit
PB: predicated region body
PF: predicated region fallthrough
CT: control target
= control target key end

     0   :  { %7 = vsyncpa [#allocation3], 0  ;;  %s937_s0 = inlined_call_operand.hbm [shape: f32[8,8], index: 0, kind: input, shape index: {}]   ;;  %s938_s1 = inlined_call_operand.hbm [shape: f32[2,8,512], index: 1, kind: input, shape index: {}]   ;;  %s939_s2 = inlined_call_operand.hbm [shape: f32[2,8,512], index: 2, kind: output, shape index: {}]  }
   0x1   :  { %8 = vsyncpa [#allocation6], 0 }
   0x2   :  { %10 = vsyncpa [#allocation6 + $0x1], 0 }
   0x3   :  { %11 = vsyncpa [#allocation4], 0 }
   0x4   :  { %13 = vsyncpa [#allocation4 + $0x1], 0  ;;  %s721_s9 = smov 0   ;;  %s723_s10 = smov 0  }
   0x5   :  { %s725_s11 = smov 0   ;;  %s727_s12 = smov 0  }
   0x6   :  { %s729_s13 = smov 0   ;;  %s731_s14 = smov 0  }
   0x7 LB: > { %s461_s15 = sadd.s32 4294967295, %s700_s14   ;;  %s462_s16 = sadd.s32 4294967294, %s700_s14   ;;  %s700_s14 = sphi %s731_s14, %s19_s14   ;;  %s696_s13 = sphi %s729_s13, %s964_s13   ;;  %s692_s12 = sphi %s727_s12, %s963_s12   ;;  %s688_s11 = sphi %s725_s11, %s962_s11   ;;  %s684_s10 = sphi %s723_s10, %s961_s10   ;;  %s680_s9 = sphi %s721_s9, %s960_s9  }
   0x8   : > { %p74_p0 = scmp.ne.s32.totalorder %s684_s10, %s680_s9  ;;  %p755_p1 = scmp.eq.s32.totalorder %s461_s15, 0 }
   0x9   : > { %p759_p2 = scmp.eq.s32.totalorder %s461_s15, 1  ;;  %p106_p3 = scmp.eq.s32.totalorder %s462_s16, 1 }
   0xa   : > { %s944_s17 = scalar_select %p755_p1, 1, 0 }
   0xb   : > { %s945_s18 = scalar_select %p759_p2, 1, 0 }
   0xc   : > { %p765_p4 = por %p755_p1, %p74_p0  ;;  %p463_p5 = scmp.ge.s32.totalorder %s700_s14, 1 }
   0xd   : > { %p770_p6 = por %p106_p3, %p74_p0  ;;  %p113_p7 = scmp.lt.s32.totalorder %s700_s14, 3 }
   0xe   : > { %s946_s19 = scalar_select %p765_p4, 1, 0 }
   0xf   : > { %s947_s20 = scalar_select %p770_p6, 1, 0 }
  0x10   : > { %p775_p8 = pnand %p463_p5, %p113_p7  ;;  %s702_s22 = smov [#allocation2]  }
  0x11   : > { %s126_s23 = sshll.u32 %s702_s22, 4  ;;  %s31_s25 = sadd.s32 1, %s696_s13  ;;  %s127_s23 = int_to_ptr.vmem [resolvable:$true] %s126_s23 }
  0x12   : > { %s948_s21 = scalar_select %p775_p8, 1, 0 }
  0x13   : > { %p490_p10 = pneg %p775_p8  ;;  %s61_s26 = sadd.s32 1, %s688_s11 }
  0x14   : > { %p790_p12 = scmp.ge.s32.totalorder %s31_s25, 2  ;;  %s556_s30 = scalar_lea.hbm %s937_s0, 128 }
  0x15   : > { %p784_p11 = pnand %p490_p10, %p755_p1  ;;  %p557_p13 = scmp.ne.s32.totalorder %s937_s0, %s556_s30 }
  0x16   : > { %s950_s27 = scalar_select %p790_p12, 1, 0 }
  0x17   : > { %p558_p0 = pneg %p784_p11  ;;  %p563_p7 = scmp.lt.u32.totalorder %s556_s30, %s937_s0 }
  0x19   : > { %p559_p3 = pnand %p558_p0, %p557_p13 }
  0x1b   : > { %p560_p5 = pneg %p559_p3 }
  0x1d   : > { %p565_p10 = pnand %p563_p7, %p560_p5 }
  0x1f   : > { %568 = shalt.err (!%p565_p10)
}
  0x20   : > { %s569_s7 = scalar_lea.vmem %s127_s23, 128  ;;  %p577_p1 = scmp.lt.s32.totalorder %s127_s23, %s127_s23 }
  0x21   : > { %p570_p9 = scmp.ne.s32.totalorder %s127_s23, %s569_s7  ;;  %p578_p8 = scmp.lt.s32.totalorder %s569_s7, %s569_s7 }
  0x23   : > { %p572_p6 = pnand %p570_p9, %p558_p0  ;;  %p579_p2 = por %p578_p8, %p577_p1 }
  0x25   : > { %p573_p4 = pneg %p572_p6 }
  0x27   : > { %p580_p12 = pnand %p579_p2, %p573_p4 }
  0x29   : > { %583 = shalt.err (!%p580_p12)
}
  0x2a   : > { %493 = dma.hbm_to_vmem [thread:$0]  (!%p784_p11), %s937_s0, 128, %s127_s23, [#allocation3]  }
  0x2b   : > { %p951_p1 = scmp.ne.s32.totalorder %s950_s27, 0  ;;  %p68_p2 = scmp.ne.s32.totalorder %s688_s11, %s684_s10 }
  0x2c   : > { %p69_p4 = scmp.eq.s32.totalorder %s700_s14, 0  ;;  %p503_p6 = scmp.lt.s32.totalorder %s700_s14, 2 }
  0x2d   : > { %s966_s25 = smov (%p951_p1, %s31_s25), 0  ;;  %p952_p12 = scmp.ne.s32.totalorder %s945_s18, 0 }
  0x2e   : > { %s56_s16 = ssub.s32 %s696_s13, %s966_s25  ;;  %p70_p9 = por %p69_p4, %p68_p2 }
  0x2f   : > { %p59_p8 = scmp.eq.s32.totalorder %s56_s16, 0  ;;  %p822_p13 = por %p952_p12, %p68_p2 }
  0x30   : > { %s137_s24 = sand.u32 1, %s688_s11   ;;  %s480_s27 = sshll.u32 %s696_s13, 9 }
  0x31   : > { %s830_s28 = scalar_select %p59_p8, %s688_s11, %s61_s26  }
  0x32   : > { %s466_s23 = sshll.u32 %s137_s24, 5  ;;  %s836_s3 = scalar_lea.hbm %s938_s1, %s480_s27 }
  0x33   : > { %s141_s18 = scalar_lea.vmem [#allocation5], %s466_s23  ;;  %p840_p11 = pnand %p503_p6, %p70_p9 }
  0x34   : > { %s151_s4 = sshll.u32 %s141_s18, 4  ;;  %s138_s26 = scalar_lea.sflag [#allocation6], %s137_s24  ;;  %s838_s4 = int_to_ptr.vmem [resolvable:$true] %s151_s4 }
  0x35   : > { %s584_s6 = scalar_lea.hbm %s836_s3, 512  ;;  %p586_p3 = pneg %p840_p11 }
  0x36   : > { %p585_p0 = scmp.ne.s32.totalorder %s836_s3, %s584_s6  ;;  %s589_s15 = scalar_lea.hbm %s938_s1, 1024 }
  0x37   : > { %p590_p10 = scmp.lt.u32.totalorder %s836_s3, %s938_s1  ;;  %p591_p1 = scmp.lt.u32.totalorder %s589_s15, %s584_s6 }
  0x38   : > { %p587_p5 = pnand %p586_p3, %p585_p0  ;;  %p593_p4 = scmp.lt.u32.totalorder %s584_s6, %s836_s3 }
  0x39   : > { %p592_p2 = por %p591_p1, %p590_p10 }
  0x3a   : > { %p588_p7 = pneg %p587_p5 }
  0x3b   : > { %p594_p6 = por %p593_p4, %p592_p2 }
  0x3d   : > { %p595_p8 = pnand %p594_p6, %p588_p7 }
  0x3f   : > { %598 = shalt.err (!%p595_p8)
}
  0x40   : > { %s599_s24 = scalar_lea.vmem %s838_s4, 512  ;;  %s703_s27 = smov [#allocation5]  }
  0x41   : > { %p600_p9 = scmp.ne.s32.totalorder %s838_s4, %s599_s24  ;;  %s604_s29 = sshll.u32 %s703_s27, 4  ;;  %s605_s29 = int_to_ptr.vmem [resolvable:$false] %s604_s29 }
  0x42   : > { %s606_s30 = scalar_lea.vmem %s605_s29, 1024  ;;  %p607_p5 = scmp.lt.s32.totalorder %s838_s4, %s605_s29 }
  0x43   : > { %p602_p12 = pnand %p600_p9, %p586_p3  ;;  %p608_p10 = scmp.lt.s32.totalorder %s606_s30, %s599_s24 }
  0x45   : > { %p603_p0 = pneg %p602_p12  ;;  %p609_p1 = por %p608_p10, %p607_p5 }
  0x47   : > { %p610_p2 = pnand %p609_p1, %p603_p0 }
  0x49   : > { %613 = shalt.err (!%p610_p2)
}
  0x4a   : > { %497 = dma.hbm_to_vmem [thread:$0]  (!%p840_p11), %s836_s3, 512, %s838_s4, %s138_s26  }
  0x4b   : > { %p955_p7 = scmp.ne.s32.totalorder %s948_s21, 0 }
  0x4c   : > { %p956_p3 = scmp.ne.s32.totalorder (!%p955_p7), %s944_s17, 0 }
  0x4d   : > { %160 = sbr.rel (%p955_p7) target bundleno = 320 (0x140), region = 28 }
  0x54   : > { %667 = dma.done.wait (%p956_p3), [#allocation3], 128  }
  0x55   : > { %669 = vsyncadd (%p956_p3), [#allocation3], 4294967168  ;;  %s876_s18 = sand.u32 1, %s684_s10   ;;  %p957_p4 = scmp.ne.s32.totalorder %s946_s19, 0 }
  0x56   : > { %s471_s6 = sshll.u32 %s876_s18, 5  ;;  %s167_s5 = scalar_lea.sflag [#allocation6], %s876_s18 }
  0x57   : > { %s170_s7 = scalar_lea.vmem [#allocation5], %s471_s6 }
  0x58   : > { %671 = dma.done.wait (%p957_p4), %s167_s5, 512  }
  0x59   : > { %673 = vsyncadd (%p957_p4), %s167_s5, 4294966784  ;;  %v704_v0 = vmov 0.0   ;;  %v195_v1 = vld [vmem:[%s170_s7 + $0x8] sm:$0xff]  ;;  %v197_v2 = vld [vmem:[%s170_s7 + $0x18] sm:$0xff]  ;;  %vm198_vm0 = vcmask 64512   ;;  %s190_s17 = scalar_lea.vmem [#allocation7], %s471_s6 }
  0x5a   : > { %266 = vmatprep.mubr.f32.mxu0 %v704_v0  ;;  %337 = vmatprep.mubr.f32.mxu1 %v704_v0  ;;  %v194_v3 = vld [vmem:[%s170_s7] sm:$0xff]  ;;  %v196_v4 = vld [vmem:[%s170_s7 + $0x10] sm:$0xff]  ;;  %v193_v5 = vld [vmem:[#allocation2] sm:$0xff]  ;;  %s365_s19 = sshll.u32 %s190_s17, 4  ;;  %s481_s21 = sshll.u32 %s692_s12, 9  ;;  %s885_s19 = int_to_ptr.vmem [resolvable:$true] %s365_s19 }
  0x5b   : > { %202 = vmatprep.subr.mxu0 %v195_v1  ;;  %273 = vmatprep.subr.mxu1 %v197_v2  ;;  %s890_s26 = scalar_lea.hbm %s939_s2, %s481_s21  ;;  %s349_s8 = scalar_lea.sflag [#allocation4], %s876_s18 }
  0x5c   : > { %203 = vmatpush1.msra.mxu0 %v194_v3  ;;  %274 = vmatpush1.msra.mxu1 %v196_v4  ;;  %s614_s12 = scalar_lea.vmem %s885_s19, 512  ;;  %s705_s15 = smov [#allocation7]  }
  0x5d   : > { %473 = vmatmul.mubr.msk.f32.vlgmr.msra.gmra.mrb[0].mxu0 %vm198_vm0, %v193_v5  ;;  %474 = vmatmul.mubr.msk.f32.vlgmr.msra.gmra.mrb[0].mxu1 %vm198_vm0, %v193_v5  ;;  %p615_p11 = scmp.ne.s32.totalorder %s885_s19, %s614_s12  ;;  %s618_s16 = sshll.u32 %s705_s15, 4  ;;  %s619_s16 = int_to_ptr.vmem [resolvable:$false] %s618_s16 }
  0x5e   : > { %s620_s23 = scalar_lea.vmem %s619_s16, 1024  ;;  %p621_p9 = scmp.lt.s32.totalorder %s885_s19, %s619_s16 }
  0x5f   : > { %p616_p6 = pnand %p615_p11, %p822_p13  ;;  %p622_p12 = scmp.lt.s32.totalorder %s620_s23, %s614_s12 }
  0x61   : > { %p617_p8 = pneg %p616_p6  ;;  %p623_p0 = por %p622_p12, %p621_p9 }
  0x63   : > { %p624_p5 = pnand %p623_p0, %p617_p8 }
 0x130   : > { %v268_v6 = vpop.f32.mrb[0].mxu0  ;;  %v339_v7 = vpop.f32.mrb[0].mxu1 }
 0x131   : > { %344 = vst [vmem:[%s190_s17] sm:$0xff] %v268_v6  ;;  %346 = vst [vmem:[%s190_s17 + $0x10] sm:$0xff] %v339_v7  ;;  %v270_v8 = vpop.f32.mrb[1].mxu0  ;;  %v341_v9 = vpop.f32.mrb[1].mxu1 }
 0x132   : > { %345 = vst [vmem:[%s190_s17 + $0x8] sm:$0xff] %v270_v8  ;;  %347 = vst [vmem:[%s190_s17 + $0x18] sm:$0xff] %v341_v9 }
 0x133   : > { %627 = shalt.err (!%p624_p5)
}
 0x134   : > { %s628_s24 = scalar_lea.hbm %s890_s26, 512  ;;  %s632_s30 = scalar_lea.hbm %s939_s2, 1024 }
 0x135   : > { %p629_p10 = scmp.ne.s32.totalorder %s890_s26, %s628_s24  ;;  %p633_p7 = scmp.lt.u32.totalorder %s890_s26, %s939_s2 }
 0x136   : > { %p634_p3 = scmp.lt.u32.totalorder %s632_s30, %s628_s24  ;;  %p636_p11 = scmp.lt.u32.totalorder %s628_s24, %s890_s26 }
 0x137   : > { %p630_p1 = pnand %p629_p10, %p822_p13 }
 0x138   : > { %p635_p4 = por %p634_p3, %p633_p7 }
 0x139   : > { %p631_p2 = pneg %p630_p1 }
 0x13a   : > { %p637_p6 = por %p636_p11, %p635_p4 }
 0x13c   : > { %p638_p8 = pnand %p637_p6, %p631_p2 }
 0x13e   : > { %641 = shalt.err (!%p638_p8)
}
 0x13f   : > { %488 = dma.vmem_to_hbm [thread:$0]  (%p822_p13), %s885_s19, 512, %s890_s26, %s349_s8  }
 0x140 PF: > { %s377_s5 = sand.u32 1, %s680_s9   ;;  %p958_p9 = scmp.ne.s32.totalorder %s947_s20, 0 }
 0x141   : > { %p959_p12 = scmp.ge.s32.totalorder %s700_s14, 2  ;;  %s378_s7 = scalar_lea.sflag [#allocation4], %s377_s5 }
 0x143   : > { %p499_p0 = pnand %p959_p12, %p958_p9 }
 0x145   : > { %675 = dma.done.wait (!%p499_p0), %s378_s7, 512  }
 0x146   : > { %677 = vsyncadd (!%p499_p0), %s378_s7, 4294966784  ;;  %s19_s14 = sadd.s32 1, %s700_s14   ;;  %s960_s9 = smov %s684_s10 }
 0x147   : > { %p16_p5 = scmp.ge.s32.totalorder %s19_s14, 4   ;;  %s961_s10 = smov %s688_s11 }
 0x148   : > { %s962_s11 = smov %s830_s28  ;;  %s963_s12 = smov %s696_s13 }
 0x149   : > { %s964_s13 = smov %s966_s25  ;;  %18 = sbr.rel (!%p16_p5) target bundleno = 7 (0x7), region = 78 }
 0x150   :  { %383 = vsyncpa [#allocation3], 1 }
 0x151   :  { %385 = vsyncpa [#allocation3 + $0x1], 1 }
 0x152   :  { %386 = vsyncpa [#allocation6], 1 }
 0x153   :  { %388 = vsyncpa [#allocation6 + $0x1], 1 }
 0x154   :  { %389 = vsyncpa [#allocation4], 1 }
 0x155   :  { %391 = vsyncpa [#allocation4 + $0x1], 1 }

</bundles_post_ra>
